<compile_context>
chip_gen: v7x
topology: tpu7x:2x2x1
jax: 0.10.0
libtpu: 0.0.40
codegen_flags: <defaults>
</compile_context>

<pallas_src>
import jax
import jax.numpy as jnp
from jax.experimental import pallas as pl
from jax.experimental.pallas import tpu as pltpu


def _awl_kernel(x_ref, out_ref):
    x = x_ref[...]                                 # (2, num) f32 in VMEM
    p = x[0:1, :]                                  # row 0: params
    loss = x[1:2, :]                               # row 1: losses
    p2 = p * p                                     # VPU
    inv = pl.reciprocal(p2, approx=False)          # EUP, exact (matches 1/p2)
    terms = 0.5 * inv * loss + jnp.log1p(p2)       # VPU + EUP
    out_ref[0, 0] = jnp.sum(terms)                 # XLU lane-reduce -> SMEM scalar


def automatic_weighted_loss(params, losses):
    """params: (num,) f32, losses: (num,) f32 -> scalar f32."""
    packed = jnp.stack(
        [params.astype(jnp.float32), losses.astype(jnp.float32)], axis=0
    )  # (2, num): one input DMA instead of two

    out = pl.pallas_call(
        _awl_kernel,
        out_shape=jax.ShapeDtypeStruct((1, 1), jnp.float32),
        in_specs=[pl.BlockSpec(memory_space=pltpu.VMEM)],   # full (2, num) block
        out_specs=pl.BlockSpec(memory_space=pltpu.SMEM),    # scalar result in SMEM
    )(packed)
    return out[0, 0]


def reference(params, losses):
    p2 = params ** 2
    return jnp.sum(0.5 / p2 * losses + jnp.log(1.0 + p2))


if __name__ == "__main__":
    num = 3
    # Deterministic parameter init, matching torch.ones(num).
    params = jnp.ones((num,), dtype=jnp.float32)

    # Three synthetic scalar losses (e.g. outputs of other loss heads).
    key = jax.random.PRNGKey(0)
    losses = jax.random.uniform(key, (num,), dtype=jnp.float32, minval=0.1, maxval=2.0)

    out = automatic_weighted_loss(params, losses)
    out = jax.block_until_ready(out)

    ref = reference(params, losses)
    assert jnp.allclose(out, ref, rtol=1e-5, atol=1e-5), (out, ref)
    print("KERNEL_OK")
</pallas_src>

<mosaic_0001>
module attributes {stable_mosaic.version = 11 : i64} {
  func.func @_awl_kernel(%arg0: memref<2x3xf32, #tpu.memory_space<vmem>>, %arg1: memref<1x1xf32, #tpu.memory_space<smem>>) attributes {dimension_semantics = [], scalar_prefetch = 0 : i64, scratch_operands = 0 : i64, tpu.core_type = #tpu.core_type<tc>} {
    %c0 = arith.constant 0 : index
    %c0_0 = arith.constant 0 : index
    %0 = vector.load %arg0[%c0, %c0_0] : memref<2x3xf32, #tpu.memory_space<vmem>>, vector<2x3xf32>
    %1 = vector.extract_strided_slice %0 {offsets = [0, 0], sizes = [1, 3], strides = [1, 1]} : vector<2x3xf32> to vector<1x3xf32>
    %2 = vector.extract_strided_slice %0 {offsets = [1, 0], sizes = [1, 3], strides = [1, 1]} : vector<2x3xf32> to vector<1x3xf32>
    %3 = arith.mulf %1, %1 : vector<1x3xf32>
    %4 = tpu.reciprocal %3 : vector<1x3xf32> -> vector<1x3xf32>
    %cst = arith.constant 5.000000e-01 : f32
    %5 = vector.broadcast %cst : f32 to vector<1x3xf32>
    %6 = arith.mulf %5, %4 : vector<1x3xf32>
    %7 = arith.mulf %6, %2 : vector<1x3xf32>
    %8 = math.log1p %3 : vector<1x3xf32>
    %9 = arith.addf %7, %8 : vector<1x3xf32>
    %10 = vector.shape_cast %9 : vector<1x3xf32> to vector<1x1x3xf32>
    %cst_1 = arith.constant dense<0.000000e+00> : vector<1xf32>
    %11 = vector.multi_reduction <add>, %10, %cst_1 [1, 2] : vector<1x1x3xf32> to vector<1xf32>
    %12 = vector.shape_cast %11 : vector<1xf32> to vector<1x1x1xf32>
    %13 = vector.extract %12[0, 0, 0] : f32 from vector<1x1x1xf32>
    %c0_2 = arith.constant 0 : index
    %c0_3 = arith.constant 0 : index
    %14 = memref.load %arg1[%c0_2, %c0_3] : memref<1x1xf32, #tpu.memory_space<smem>>
    memref.store %13, %arg1[%c0_2, %c0_3] : memref<1x1xf32, #tpu.memory_space<smem>>
    return
  }
}

</mosaic_0001>

<bundles_post_ra>
// kernel: tpu_custom_call.1
= control target key start
LH: loop header
LB: loop body
LE: loop exit
PB: predicated region body
PF: predicated region fallthrough
CT: control target
= control target key end

     0   :  { %6 = vsyncpa [#allocation3], 0  ;;  %s146_s0 = inlined_call_operand.hbm [shape: f32[2,3], index: 0, kind: input, shape index: {}]   ;;  %s147_s1 = inlined_call_operand.hbm [shape: f32[1,1], index: 1, kind: output, shape index: {}]  }
   0x1   :  { %7 = vsyncpa [#allocation4], 0  ;;  %s110_s6 = smov [#allocation2]   ;;  %s74_s10 = scalar_lea.hbm %s146_s0, 32 }
   0x2   :  { %s14_s7 = sshll.u32 %s110_s6, 4  ;;  %p75_p0 = scmp.ne.s32.totalorder %s146_s0, %s74_s10  ;;  %s15_s7 = int_to_ptr.vmem [resolvable:$true] %s14_s7 }
   0x3   :  { %p78_p1 = scmp.lt.u32.totalorder %s74_s10, %s146_s0 }
   0x5   :  { %p80_p2 = pnand %p78_p1, %p75_p0 }
   0x7   :  { %83 = shalt.err (!%p80_p2)
}
   0x8   :  { %s84_s15 = scalar_lea.vmem %s15_s7, 32  ;;  %p89_p4 = scmp.lt.s32.totalorder %s15_s7, %s15_s7 }
   0x9   :  { %p85_p3 = scmp.ne.s32.totalorder %s15_s7, %s84_s15  ;;  %p90_p5 = scmp.lt.s32.totalorder %s84_s15, %s84_s15 }
   0xb   :  { %p91_p6 = por %p90_p5, %p89_p4 }
   0xd   :  { %p92_p7 = pnand %p91_p6, %p85_p3 }
   0xf   :  { %95 = shalt.err (!%p92_p7)
}
  0x10   :  { %17 = dma.hbm_to_vmem [thread:$0]  %s146_s0, 32, %s15_s7, [#allocation3]  }
  0x11   :  { %106 = dma.done.wait [#allocation3], 32  }
  0x12   :  { %107 = vsyncadd [#allocation3], 4294967264  ;;  %v21_v0 = vld [vmem:[#allocation2] sm:$0x3]  ;;  %vm39_vm1 = vcmask 16384   ;;  %s96_s20 = scalar_lea.hbm %s147_s1, 16 }
  0x13   :  { %v22_v1 = vmul.f32 %v21_v0, %v21_v0  ;;  %v26_v6 = vrot.slane %v21_v0, 1  ;;  %p97_p8 = scmp.ne.s32.totalorder %s147_s1, %s96_s20  ;;  %p100_p9 = scmp.lt.u32.totalorder %s96_s20, %s147_s1 }
  0x15   :  { %70 = vrcp.f32 %v22_v1  ;;  %v29_v2 = vadd.f32 1.0, %v22_v1  ;;  %v32_v3 = vmul.f32 -0.5, %v22_v1  ;;  %v35_v5 = vand.u32 2147483647, %v22_v1  ;;  %p102_p10 = pnand %p100_p9, %p97_p8 }
  0x17   :  { %72 = vlog2.f32 %v29_v2  ;;  %v33_v4 = vadd.f32 1.0, %v32_v3  ;;  %vm36_vm0 = vcmp.lt.f32.partialorder %v35_v5, 0.0004427343 }
  0x19   :  { %v34_v9 = vmul.f32 %v33_v4, %v22_v1 }
  0x1f   :  { %v71_v7 = vpop.eup %70 }
  0x20   :  { %v24_v8 = vmul.f32 0.5, %v71_v7 }
  0x21   :  { %v73_v10 = vpop.eup %72 }
  0x22   :  { %v28_v11 = vmul.f32 %v26_v6, %v24_v8  ;;  %v31_v12 = vmul.f32 0.6931472, %v73_v10 }
  0x24   :  { %v37_v13 = vsel %vm36_vm0, %v34_v9, %v31_v12 }
  0x25   :  { %v38_v14 = vadd.f32 %v37_v13, %v28_v11 }
  0x27   :  { %v40_v15 = vsel %vm39_vm1, %v38_v14, 0.0 }
  0x28   :  { %41 = vadd.xlane.f32.xlu0 %v40_v15 }
  0xb5   :  { %v42_v16 = vpop.xlane.xlu0 %41 }
  0xb6   :  { %v43_v17 = vrot.slane %v42_v16, 4 }
  0xb8   :  { %v44_v18 = vadd.f32 %v43_v17, %v42_v16 }
  0xba   :  { %v45_v19 = vrot.slane %v44_v18, 2 }
  0xbc   :  { %v46_v20 = vadd.f32 %v45_v19, %v44_v18 }
  0xbe   :  { %v47_v21 = vrot.slane %v46_v20, 1 }
  0xc0   :  { %v48_v22 = vadd.f32 %v47_v21, %v46_v20 }
  0xc2   :  { %66 = vpush %v48_v22 }
  0xf3   :  { %s67_s0 = spop %66 }
  0xf4   :  { %51 = sst [smem:[#allocation5]] %s67_s0 }
  0xf5   :  { %105 = shalt.err (!%p102_p10)
}
  0xf6   :  { %s111_s25 = smov [#allocation5]  }
  0xf7   :  { %59 = dma.smem_to_hbm %s111_s25, 16, %s147_s1, [#allocation4]  }
  0xf8   :  { %108 = dma.done.wait [#allocation4], 16  }
  0xf9   :  { %109 = vsyncadd [#allocation4], 4294967280 }
  0xfa   :  { %63 = sfence }
  0xfb   :  { %64 = vsyncpa [#allocation3], 1 }
  0xfc   :  { %65 = vsyncpa [#allocation4], 1 }

</bundles_post_ra>
